<compile_context>
chip_gen: v6e
topology: v6e:2x2x1
jax: 0.10.0
libtpu: 0.0.40
codegen_flags: <defaults>
</compile_context>

<pallas_src>
import jax
import jax.numpy as jnp
from jax.experimental import pallas as pl
from jax.experimental.pallas import tpu as pltpu


def _round_up(a, m):
    return ((a + m - 1) // m) * m


def _pick_tile(dim, target, align):
    """Largest divisor of `dim` <= target that is a multiple of `align`;
    falls back to the full dim (full dims always satisfy the (8,128) rule)."""
    if dim <= target:
        return dim
    for t in range(target, 0, -1):
        if dim % t == 0 and t % align == 0:
            return t
    return dim


def _choose_channel_tile(c, target, align):
    """Return (tc, c_pad): channel tile and (possibly zero-padded) channel extent."""
    if c <= max(target, align):
        return c, c                                 # single step, full-dim block
    target = max(align, (target // align) * align)
    for t in range(target, align - 1, -1):
        if c % t == 0 and t % align == 0:
            return t, c
    # No friendly divisor: zero-pad channels to a multiple of the target tile.
    return target, _round_up(c, target)


def _head_kernel(x_ref, w_ref, b_ref, o_ref):
    # x_ref: [TN, TC, HW]   input dtype (f32 / bf16 / f16)
    # w_ref: [Cp, Kp] f32 (fully VMEM-resident)  OR  [TC, Kp] f32 (streamed)
    # b_ref: [1,  Kp] f32 (zero-padded classes)
    # o_ref: [TN, Kp] f32 — block index constant along the channel (reduction)
    #                       grid axis, so it stays resident and is used directly
    #                       as the accumulator.
    k_idx = pl.program_id(1)
    tc = x_ref.shape[1]
    hw = x_ref.shape[2]

    @pl.when(k_idx == 0)
    def _():
        o_ref[...] = jnp.zeros_like(o_ref)

    # Global spatial SUM; the 1/(H*W) of the mean is folded into the finalize.
    if hw % 128 == 0 and 128 < hw <= 2048:
        # VPU-add 128-lane chunks, finish with a single lane (XLU) reduce.
        acc = x_ref[:, :, 0:128].astype(jnp.float32)
        for i in range(1, hw // 128):
            acc = acc + x_ref[:, :, i * 128:(i + 1) * 128].astype(jnp.float32)
        pooled = jnp.sum(acc, axis=-1)                                  # [TN, TC]
    else:
        # TODO(synk): for 7x7 heads (hw=49) a channels-last [N, HW, C] layout from
        #             the backbone would keep this reduce entirely off the XLU.
        pooled = jnp.sum(x_ref[...].astype(jnp.float32), axis=-1)       # [TN, TC]

    if w_ref.shape[0] == tc:
        # Streamed weight tile (or single channel step).
        w_tile = w_ref[...]
    else:
        # Fully resident weight: slice this channel step's rows (tc-aligned start).
        start = pl.multiple_of(k_idx * tc, tc)
        w_tile = w_ref[pl.ds(start, tc), :]

    o_ref[...] += jnp.dot(pooled, w_tile, preferred_element_type=jnp.float32)

    @pl.when(k_idx == pl.num_programs(1) - 1)
    def _():
        # Apply the mean's 1/(H*W) once, then the bias (exact, f32).
        o_ref[...] = o_ref[...] * (1.0 / hw) + b_ref[...]


class BaseHeadPallas:
    """JAX/Pallas equivalent of BaseHead with the canonical head forward."""

    def __init__(self, num_classes, in_channels, multi_class=False,
                 label_smooth_eps=0.0, topk=(1, 5)):
        self.num_classes = num_classes
        self.in_channels = in_channels
        self.multi_class = multi_class
        self.label_smooth_eps = label_smooth_eps
        assert isinstance(topk, (int, tuple))
        if isinstance(topk, int):
            topk = (topk,)
        for _topk in topk:
            assert _topk > 0, 'Top-k should be larger than 0'
        self.topk = topk

        # Deterministic parameter init (nn.Linear shapes: weight [K, C], bias [K]).
        key = jax.random.PRNGKey(0)
        kw, kb = jax.random.split(key)
        bound = 1.0 / (in_channels ** 0.5)
        self.weight = jax.random.uniform(kw, (num_classes, in_channels),
                                         minval=-bound, maxval=bound,
                                         dtype=jnp.float32)   # [K, C] torch convention
        self.bias = jax.random.uniform(kb, (num_classes,),
                                       minval=-bound, maxval=bound,
                                       dtype=jnp.float32)     # [K]

        # Hoisted out of the per-call path: transpose + lane-dense zero padding
        # of the class dim (unmasked stores, full MXU lanes).
        self._k_pad = max(128, _round_up(num_classes, 128))
        w_ck = self.weight.T                                               # [C, K]
        self._w_pad = jnp.zeros((in_channels, self._k_pad), jnp.float32
                                ).at[:, :num_classes].set(w_ck)            # [C, Kp] f32
        self._b_pad = jnp.zeros((1, self._k_pad), jnp.float32
                                ).at[:, :num_classes].set(self.bias)       # [1, Kp]

    def __call__(self, x, *, vmem_budget_bytes=None):
        # x: NCHW [N, C, H, W]; f32 or bf16/f16 straight from the backbone
        # (no wrapper-side downcast — that would be an extra HBM pass).
        n, c, h, w = x.shape
        assert c == self.in_channels
        hw = h * w
        kpad = self._k_pad
        x_flat = x.reshape(n, c, hw)                                       # [N, C, HW]

        itemsize = jnp.dtype(x_flat.dtype).itemsize
        sublane = {4: 8, 2: 16, 1: 32}.get(itemsize, 8)                    # dtype packing
        hw_pad = _round_up(hw, 128)                                        # lane padding

        # Per-generation VMEM budget (v7x: 64 MiB physical -> ~32 MiB;
        # v5e/v6e: 128 MiB -> ~64 MiB).
        try:
            vmem_cap = int(pltpu.get_tpu_info().vmem_capacity_bytes)
        except Exception:
            vmem_cap = 64 << 20                                            # conservative (v7x)
        if vmem_budget_bytes is not None:
            budget = int(vmem_budget_bytes)
        else:
            budget = min(vmem_cap // 2, 96 << 20)

        # Batch tile: keep >= 2 tiles when the batch allows it so the
        # "parallel" axis can be split across both v7x TensorCores.
        if n <= 16:
            tn = n
        else:
            tn_target = min(128, max(8, ((n // 2) // 8) * 8))
            tn = _pick_tile(n, tn_target, 8)

        # Weight residency: keep the full padded weight in VMEM when small
        # enough (fetched from HBM exactly once); otherwise stream per tile.
        c_est = _round_up(c, 8)
        w_full_bytes = c_est * kpad * 4
        w_resident = 2 * w_full_bytes <= max(budget // 3, 8 << 20)

        # Channel tile sized so double-buffered x tiles + the f32 compute
        # temporary fit in the budget (all in padded bytes).
        fixed = ((2 * w_full_bytes) if w_resident else 0) \
            + 2 * 8 * kpad * 4 + 2 * _round_up(tn, 8) * kpad * 4
        per_tc = tn * hw_pad * (2 * itemsize + 4) + (0 if w_resident else 2 * kpad * 4)
        avail = max(budget - fixed, per_tc * sublane)
        tc_target = max(sublane, avail // per_tc)
        tc, c_pad = _choose_channel_tile(c, min(tc_target, c), sublane)

        # Zero-pad channels if there is no friendly divisor (zeros contribute 0
        # to both the pool sum and the matmul).
        if c_pad > c:
            x_flat = jnp.pad(x_flat, ((0, 0), (0, c_pad - c), (0, 0)))
            w_use = jnp.zeros((c_pad, kpad), jnp.float32).at[:c, :].set(self._w_pad)
        else:
            w_use = self._w_pad

        grid = (n // tn, c_pad // tc)   # reduction (channel) axis last

        if w_resident:
            w_spec = pl.BlockSpec((c_pad, kpad), lambda i, k: (0, 0))   # one HBM fetch total
        else:
            w_spec = pl.BlockSpec((tc, kpad), lambda i, k: (k, 0))      # streamed per channel tile

        # Exact padded VMEM footprint (double-buffered) + headroom, clamped to
        # the chip's physical VMEM.
        x_bytes = tn * _round_up(tc, sublane) * hw_pad * itemsize
        w_bytes = (_round_up(c_pad, 8) if w_resident else _round_up(tc, 8)) * kpad * 4
        b_bytes = 8 * kpad * 4
        o_bytes = _round_up(tn, 8) * kpad * 4
        tmp_bytes = tn * _round_up(tc, 8) * hw_pad * 4                   # f32 upcast temp
        total = 2 * (x_bytes + w_bytes + b_bytes + o_bytes) + tmp_bytes
        vmem_limit = max(16 << 20, min(int(total + (4 << 20)), int(vmem_cap * 0.9)))

        out_pad = pl.pallas_call(
            _head_kernel,
            out_shape=jax.ShapeDtypeStruct((n, kpad), jnp.float32),
            grid=grid,
            in_specs=[
                pl.BlockSpec((tn, tc, hw), lambda i, k: (i, k, 0)),
                w_spec,
                pl.BlockSpec((1, kpad), lambda i, k: (0, 0)),
            ],
            out_specs=pl.BlockSpec((tn, kpad), lambda i, k: (i, 0)),
            compiler_params=pltpu.CompilerParams(
                dimension_semantics=("parallel", "arbitrary"),
                vmem_limit_bytes=vmem_limit),
        )(x_flat, w_use, self._b_pad)

        # Slice the zero-padded classes back out (keeps top-k etc. clean).
        return out_pad[:, :self.num_classes]


if __name__ == "__main__":
    key = jax.random.PRNGKey(0)
    kx1, kx2 = jax.random.split(key)

    # Case 1: small shapes (batch=2, channels=32, 16x16 spatial, 16 classes);
    # hw is a multiple of 128 -> chunked VPU pooling path, single channel step.
    N, C, H, W, K = 2, 32, 16, 16, 16
    x = jax.random.normal(kx1, (N, C, H, W), dtype=jnp.float32)
    head = BaseHeadPallas(num_classes=K, in_channels=C)
    out = jax.block_until_ready(head(x))

    pooled_ref = jnp.mean(x.reshape(N, C, H * W), axis=-1)
    ref = pooled_ref @ head.weight.T + head.bias
    assert out.shape == (N, K)
    assert jnp.allclose(out, ref, atol=1e-5, rtol=1e-4), "case 1 mismatch vs reference"

    # Case 2: tiny forced VMEM budget -> multi-step channel reduction with the
    # resident-weight slicing path and output-as-accumulator; hw not a multiple
    # of 128 exercises the plain pooling path.
    N2, C2, H2, W2, K2 = 8, 64, 8, 8, 10
    x2 = jax.random.normal(kx2, (N2, C2, H2, W2), dtype=jnp.float32)
    head2 = BaseHeadPallas(num_classes=K2, in_channels=C2)
    out2 = jax.block_until_ready(head2(x2, vmem_budget_bytes=512 * 1024))

    pooled2 = jnp.mean(x2.reshape(N2, C2, H2 * W2), axis=-1)
    ref2 = pooled2 @ head2.weight.T + head2.bias
    assert out2.shape == (N2, K2)
    assert jnp.allclose(out2, ref2, atol=1e-5, rtol=1e-4), "case 2 mismatch vs reference"

    print("KERNEL_OK")
</pallas_src>

<mosaic_0001>
module attributes {stable_mosaic.version = 11 : i64} {
  func.func @_head_kernel(%arg0: i32, %arg1: i32, %arg2: memref<2x32x256xf32, #tpu.memory_space<vmem>>, %arg3: memref<32x128xf32, #tpu.memory_space<vmem>>, %arg4: memref<1x128xf32, #tpu.memory_space<vmem>>, %arg5: memref<2x128xf32, #tpu.memory_space<vmem>>) attributes {dimension_semantics = [#tpu.dimension_semantics<parallel>, #tpu.dimension_semantics<arbitrary>], iteration_bounds = array<i64: 1, 1>, scalar_prefetch = 0 : i64, scratch_operands = 0 : i64, tpu.core_type = #tpu.core_type<tc>, window_params = [{transform_indices = @transform_0, window_bounds = array<i64: 2, 32, 256>}, {pipeline_mode = #tpu.pipeline_mode<synchronous>, transform_indices = @transform_1, window_bounds = array<i64: 32, 128>}, {pipeline_mode = #tpu.pipeline_mode<synchronous>, transform_indices = @transform_2, window_bounds = array<i64: 1, 128>}, {transform_indices = @transform_3, window_bounds = array<i64: 2, 128>}]} {
    %c0_i32 = arith.constant 0 : i32
    %0 = arith.cmpi eq, %arg1, %c0_i32 : i32
    %1 = arith.extui %0 : i1 to i32
    %c0_i32_0 = arith.constant 0 : i32
    %2 = arith.cmpi ne, %1, %c0_i32_0 : i32
    scf.if %2 {
      %cst_14 = arith.constant 0.000000e+00 : f32
      %15 = vector.broadcast %cst_14 : f32 to vector<2x128xf32>
      %c0_15 = arith.constant 0 : index
      %c0_16 = arith.constant 0 : index
      %16 = vector.load %arg5[%c0_15, %c0_16] : memref<2x128xf32, #tpu.memory_space<vmem>>, vector<2x128xf32>
      tpu.vector_store %arg5[%c0_15, %c0_16], %15 {strides = array<i32>} : memref<2x128xf32, #tpu.memory_space<vmem>>, vector<2x128xf32>,
    } else {
    }
    %c0 = arith.constant 0 : index
    %c0_1 = arith.constant 0 : index
    %c0_2 = arith.constant 0 : index
    %3 = vector.load %arg2[%c0, %c0_1, %c0_2] : memref<2x32x256xf32, #tpu.memory_space<vmem>>, vector<2x32x128xf32>
    %c0_3 = arith.constant 0 : index
    %c0_4 = arith.constant 0 : index
    %c128 = arith.constant 128 : index
    %4 = vector.load %arg2[%c0_3, %c0_4, %c128] : memref<2x32x256xf32, #tpu.memory_space<vmem>>, vector<2x32x128xf32>
    %5 = arith.addf %3, %4 : vector<2x32x128xf32>
    %cst = arith.constant dense<0.000000e+00> : vector<2x32xf32>
    %6 = vector.multi_reduction <add>, %5, %cst [2] : vector<2x32x128xf32> to vector<2x32xf32>
    %c0_5 = arith.constant 0 : index
    %c0_6 = arith.constant 0 : index
    %7 = vector.load %arg3[%c0_5, %c0_6] : memref<32x128xf32, #tpu.memory_space<vmem>>, vector<32x128xf32>
    %c0_7 = arith.constant 0 : index
    %c0_8 = arith.constant 0 : index
    %8 = vector.load %arg5[%c0_7, %c0_8] : memref<2x128xf32, #tpu.memory_space<vmem>>, vector<2x128xf32>
    %cst_9 = arith.constant dense<0.000000e+00> : vector<2x128xf32>
    %9 = tpu.matmul %6, %7, %cst_9 {dimension_numbers = #tpu.dot_dimension_numbers<[1], [0], [0], [1], [0, 0, 1, 1], [], []>} : vector<2x32xf32>, vector<32x128xf32>, vector<2x128xf32> -> vector<2x128xf32>
    %10 = arith.addf %8, %9 : vector<2x128xf32>
    %c0_10 = arith.constant 0 : index
    %c0_11 = arith.constant 0 : index
    %11 = vector.load %arg5[%c0_10, %c0_11] : memref<2x128xf32, #tpu.memory_space<vmem>>, vector<2x128xf32>
    tpu.vector_store %arg5[%c0_10, %c0_11], %10 {strides = array<i32>} : memref<2x128xf32, #tpu.memory_space<vmem>>, vector<2x128xf32>,
    %c0_i32_12 = arith.constant 0 : i32
    %12 = arith.cmpi eq, %arg1, %c0_i32_12 : i32
    %13 = arith.extui %12 : i1 to i32
    %c0_i32_13 = arith.constant 0 : i32
    %14 = arith.cmpi ne, %13, %c0_i32_13 : i32
    scf.if %14 {
      %c0_14 = arith.constant 0 : index
      %c0_15 = arith.constant 0 : index
      %15 = vector.load %arg5[%c0_14, %c0_15] : memref<2x128xf32, #tpu.memory_space<vmem>>, vector<2x128xf32>
      %cst_16 = arith.constant 3.906250e-03 : f32
      %16 = vector.broadcast %cst_16 : f32 to vector<2x128xf32>
      %17 = arith.mulf %15, %16 : vector<2x128xf32>
      %c0_17 = arith.constant 0 : index
      %c0_18 = arith.constant 0 : index
      %18 = vector.load %arg4[%c0_17, %c0_18] : memref<1x128xf32, #tpu.memory_space<vmem>>, vector<1x128xf32>
      %19 = vector.broadcast %18 : vector<1x128xf32> to vector<2x128xf32>
      %20 = arith.addf %17, %19 : vector<2x128xf32>
      %c0_19 = arith.constant 0 : index
      %c0_20 = arith.constant 0 : index
      %21 = vector.load %arg5[%c0_19, %c0_20] : memref<2x128xf32, #tpu.memory_space<vmem>>, vector<2x128xf32>
      tpu.vector_store %arg5[%c0_19, %c0_20], %20 {strides = array<i32>} : memref<2x128xf32, #tpu.memory_space<vmem>>, vector<2x128xf32>,
    } else {
    }
    return
  }
  func.func @transform_0(%arg0: i32, %arg1: i32) -> (i32, i32, i32) {
    %c0_i32 = arith.constant 0 : i32
    %c0_i32_0 = arith.constant 0 : i32
    return %arg0, %arg1, %c0_i32 : i32, i32, i32
  }
  func.func @transform_1(%arg0: i32, %arg1: i32) -> (i32, i32) {
    %c0_i32 = arith.constant 0 : i32
    %c0_i32_0 = arith.constant 0 : i32
    %c0_i32_1 = arith.constant 0 : i32
    return %c0_i32, %c0_i32_0 : i32, i32
  }
  func.func @transform_2(%arg0: i32, %arg1: i32) -> (i32, i32) {
    %c0_i32 = arith.constant 0 : i32
    %c0_i32_0 = arith.constant 0 : i32
    %c0_i32_1 = arith.constant 0 : i32
    return %c0_i32, %c0_i32_0 : i32, i32
  }
  func.func @transform_3(%arg0: i32, %arg1: i32) -> (i32, i32) {
    %c0_i32 = arith.constant 0 : i32
    %c0_i32_0 = arith.constant 0 : i32
    return %arg0, %c0_i32 : i32, i32
  }
}

</mosaic_0001>

<bundles_post_ra>
// kernel: tpu_custom_call.1
= control target key start
LH: loop header
LB: loop body
LE: loop exit
PB: predicated region body
PF: predicated region fallthrough
CT: control target
= control target key end

     0   :  { %8 = vsyncpa [#allocation3], 0  ;;  %s388_s0 = inlined_call_operand.hbm [shape: f32[2,32,256], index: 0, kind: input, shape index: {}]   ;;  %s389_s1 = inlined_call_operand.hbm [shape: f32[32,128], index: 1, kind: input, shape index: {}]   ;;  %s390_s2 = inlined_call_operand.vmem [shape: f32[1,128], index: 2, kind: input, shape index: {}]   ;;  %s391_s3 = inlined_call_operand.hbm [shape: f32[2,128], index: 3, kind: output, shape index: {}]  }
   0x1   :  { %9 = vsyncpa [#allocation6], 0 }
   0x2   :  { %10 = vsyncpa [#allocation4], 0  ;;  %s347_s12 = smov [#allocation2]  }
   0x3   :  { %s16_s13 = sshll.u32 %s347_s12, 4  ;;  %s17_s13 = int_to_ptr.vmem [resolvable:$true] %s16_s13 }
   0x4   :  { %s289_s14 = scalar_lea.vmem %s17_s13, 2048  ;;  %p294_p1 = scmp.lt.s32.totalorder %s17_s13, %s17_s13 }
   0x5   :  { %p290_p0 = scmp.ne.s32.totalorder %s17_s13, %s289_s14  ;;  %p295_p2 = scmp.lt.s32.totalorder %s289_s14, %s289_s14 }
   0x7   :  { %p296_p3 = por %p295_p2, %p294_p1 }
   0x9   :  { %p297_p4 = pnand %p296_p3, %p290_p0 }
   0xb   :  { %300 = shalt.err (!%p297_p4)
}
   0xc   :  { %s348_s15 = smov 256   ;;  %s349_s16 = smov 16  }
   0xd   :  { %22 = dma.hbm_to_vmem [thread:$0]  %s388_s0, 2048, %s17_s13, [#allocation3], %s348_s15, %s348_s15, %s349_s16  }
   0xe   :  { %s350_s19 = smov [#allocation5]  }
   0xf   :  { %s28_s20 = sshll.u32 %s350_s19, 4  ;;  %s29_s20 = int_to_ptr.vmem [resolvable:$true] %s28_s20 }
  0x10   :  { %s309_s21 = scalar_lea.vmem %s29_s20, 512  ;;  %p314_p6 = scmp.lt.s32.totalorder %s29_s20, %s29_s20 }
  0x11   :  { %p310_p5 = scmp.ne.s32.totalorder %s29_s20, %s309_s21  ;;  %p315_p7 = scmp.lt.s32.totalorder %s309_s21, %s309_s21 }
  0x13   :  { %p316_p8 = por %p315_p7, %p314_p6 }
  0x15   :  { %p317_p9 = pnand %p316_p8, %p310_p5 }
  0x17   :  { %320 = shalt.err (!%p317_p9)
}
  0x18   :  { %s351_s22 = smov 128   ;;  %s352_s23 = smov 8  }
  0x19   :  { %34 = dma.hbm_to_vmem [thread:$0]  %s389_s1, 512, %s29_s20, [#allocation6], %s351_s22, %s351_s22, %s352_s23  }
  0x1a   :  { %341 = dma.done.wait [#allocation3], 2048  }
  0x1b   :  { %342 = vsyncadd [#allocation3], 4294965248 }
  0x1c   :  { %343 = dma.done.wait [#allocation6], 512  }
  0x1d   :  { %344 = vsyncadd [#allocation6], 4294966784  ;;  %v52_v0 = vld [vmem:[#allocation2 + $0x40] sm:$0xff]  ;;  %v60_v1 = vld [vmem:[#allocation2 + $0x48] sm:$0xff]  ;;  %v353_v24 = vmov 0.0   ;;  %vm354_vm0 = vmmov 0   ;;  %v101_v29 = vlaneseq }
  0x1e   :  { %v48_v2 = vld [vmem:[#allocation2] sm:$0xff]  ;;  %v68_v3 = vadd.f32 %v60_v1, %v52_v0  ;;  %v56_v4 = vld [vmem:[#allocation2 + $0x8] sm:$0xff]  ;;  %v53_v5 = vld [vmem:[#allocation2 + $0x50] sm:$0xff]  ;;  %261 = vmatprep.subr.mxu0 %v353_v24  ;;  %47 = vst [vmem:[#allocation7] sm:$0x3] %v353_v24  ;;  %269 = vmatprep.mubr.msk.f32.mxu0 %vm354_vm0, %v353_v24  ;;  %vm112_vm1 = vcmask 130112  }
  0x1f   :  { %v61_v6 = vld [vmem:[#allocation2 + $0x58] sm:$0xff]  ;;  %v64_v7 = vadd.f32 %v56_v4, %v48_v2  ;;  %v49_v8 = vld [vmem:[#allocation2 + $0x10] sm:$0xff]  ;;  %v54_v12 = vld [vmem:[#allocation2 + $0x60] sm:$0xff]  ;;  %v102_v30 = vand.u32 127, %v101_v29  ;;  %v104_v35 = vshrl.u32 %v101_v29, 7  ;;  %vm119_vm2 = vcmask 195712  }
  0x20   :  { %v57_v9 = vld [vmem:[#allocation2 + $0x18] sm:$0xff]  ;;  %80 = vadd.xlane.f32.xlu1 %v68_v3  ;;  %v69_v10 = vadd.f32 %v61_v6, %v53_v5  ;;  %v62_v13 = vld [vmem:[#allocation2 + $0x68] sm:$0xff]  ;;  %v50_v14 = vld [vmem:[#allocation2 + $0x20] sm:$0xff]  ;;  %vm126_vm3 = vcmask 261312   ;;  %vm147_vm4 = vcmask 1041409   ;;  %vm149_vm5 = vcmask 261120  }
  0x21   :  { %72 = vadd.xlane.f32.xlu0 %v64_v7  ;;  %v65_v11 = vadd.f32 %v57_v9, %v49_v8  ;;  %v58_v15 = vld [vmem:[#allocation2 + $0x28] sm:$0xff]  ;;  %v70_v16 = vadd.f32 %v62_v13, %v54_v12  ;;  %v55_v18 = vld [vmem:[#allocation2 + $0x70] sm:$0xff]  ;;  %v63_v19 = vld [vmem:[#allocation2 + $0x78] sm:$0xff]  ;;  %v107_v33 = vadd.s32 4294967288, %v102_v30  ;;  %v114_v34 = vadd.s32 4294967280, %v102_v30  ;;  %s355_s26 = smov [#allocation7]  }
  0x22   :  { %v66_v17 = vadd.f32 %v58_v15, %v50_v14  ;;  %v51_v20 = vld [vmem:[#allocation2 + $0x30] sm:$0xff]  ;;  %v59_v21 = vld [vmem:[#allocation2 + $0x38] sm:$0xff]  ;;  %v71_v22 = vadd.f32 %v63_v19, %v55_v18  ;;  %v89_v27 = vld [vmem:[#allocation5 + $0x8] sm:$0xff]  ;;  %v121_v39 = vadd.s32 4294967272, %v102_v30  ;;  %v105_v41 = vsub.s32 %v102_v30, %v104_v35  ;;  %s244_s27 = sshll.u32 %s355_s26, 4  ;;  %s245_s27 = int_to_ptr.vmem [resolvable:$true] %s244_s27 }
  0x23   :  { %v67_v23 = vadd.f32 %v59_v21, %v51_v20  ;;  %v91_v25 = vld [vmem:[#allocation5 + $0x18] sm:$0xff]  ;;  %v90_v26 = vld [vmem:[#allocation5 + $0x10] sm:$0xff]  ;;  %v88_v28 = vld [vmem:[#allocation5] sm:$0xff]  ;;  %v110_v37 = vsub.s32 %v107_v33, %v104_v35  ;;  %v117_v40 = vsub.s32 %v114_v34, %v104_v35  ;;  %s321_s28 = scalar_lea.vmem %s245_s27, 32  ;;  %p326_p11 = scmp.lt.s32.totalorder %s245_s27, %s245_s27 }
  0x24   :  { %82 = vadd.xlane.f32.xlu1 %v69_v10  ;;  %262 = vmatpush3.msra.mxu0 %v91_v25  ;;  %v124_v45 = vsub.s32 %v121_v39, %v104_v35  ;;  %v255_v3 = vld [vmem:[%s390_s2] ss:$0 sm:$0xff]  ;;  %p322_p10 = scmp.ne.s32.totalorder %s245_s27, %s321_s28  ;;  %p327_p12 = scmp.lt.s32.totalorder %s321_s28, %s321_s28 }
  0x25   :  { %74 = vadd.xlane.f32.xlu0 %v65_v11  ;;  %263 = vmatprep.subr.mxu0 %v353_v24  ;;  %v92_v62 = vld [vmem:[#allocation7] sm:$0x3] }
  0x26   :  { %264 = vmatpush3.msra.mxu0 %v90_v26  ;;  %p328_p13 = por %p327_p12, %p326_p11 }
  0x27   :  { %265 = vmatprep.subr.mxu0 %v353_v24 }
  0x28   :  { %84 = vadd.xlane.f32.xlu1 %v70_v16  ;;  %266 = vmatpush3.msra.mxu0 %v89_v27  ;;  %p329_p0 = pnand %p328_p13, %p322_p10 }
  0x29   :  { %76 = vadd.xlane.f32.xlu0 %v66_v17  ;;  %267 = vmatprep.subr.mxu0 %v353_v24 }
  0x2a   :  { %268 = vmatpush3.msra.mxu0 %v88_v28 }
  0x2c   :  { %86 = vadd.xlane.f32.xlu1 %v71_v22 }
  0x2d   :  { %78 = vadd.xlane.f32.xlu0 %v67_v23 }
  0xa9   :  { %v81_v31 = vpop.xlane.xlu1 %80 }
  0xaa   :  { %v73_v32 = vpop.xlane.xlu0 %72  ;;  %v131_v48 = vrot.slane %v81_v31, %v105_v41 }
  0xab   :  { %v106_v50 = vrot.slane %v73_v32, %v105_v41 }
  0xad   :  { %v83_v36 = vpop.xlane.xlu1 %82 }
  0xae   :  { %v75_v38 = vpop.xlane.xlu0 %74  ;;  %v135_v43 = vrot.slane %v83_v36, %v110_v37 }
  0xaf   :  { %v111_v46 = vrot.slane %v75_v38, %v110_v37 }
  0xb0   :  { %v136_v52 = vsel %vm112_vm1, %v135_v43, %v131_v48 }
  0xb1   :  { %v85_v42 = vpop.xlane.xlu1 %84  ;;  %v113_v55 = vsel %vm112_vm1, %v111_v46, %v106_v50 }
  0xb2   :  { %v77_v44 = vpop.xlane.xlu0 %76  ;;  %v140_v47 = vrot.slane %v85_v42, %v117_v40 }
  0xb3   :  { %v118_v49 = vrot.slane %v77_v44, %v117_v40 }
  0xb4   :  { %v141_v56 = vsel %vm119_vm2, %v140_v47, %v136_v52 }
  0xb5   :  { %v87_v51 = vpop.xlane.xlu1 %86  ;;  %v120_v58 = vsel %vm119_vm2, %v118_v49, %v113_v55 }
  0xb6   :  { %v145_v53 = vrot.slane %v87_v51, %v124_v45  ;;  %v79_v54 = vpop.xlane.xlu0 %78 }
  0xb7   :  { %v125_v57 = vrot.slane %v79_v54, %v124_v45 }
  0xb8   :  { %v146_v59 = vsel %vm126_vm3, %v145_v53, %v141_v56 }
  0xb9   :  { %v127_v60 = vsel %vm126_vm3, %v125_v57, %v120_v58 }
  0xba   :  { %v148_v61 = vsel %vm147_vm4, %v146_v59, %v127_v60 }
  0xbb   :  { %270 = vmatmul.mubr.msk.f32.vlgmr.msra.gmra.mxu0 %vm149_vm5, %v148_v61 }
 0x17b   :  { %v218_v63 = vpop.f32.mrf.mxu0 }
 0x17c   :  { %v222_v0 = vadd.f32 %v218_v63, %v92_v62 }
 0x17d   :  { %v271_v1 = vpop.f32.mrf.mxu0 }
 0x17e   :  { %223 = vst [vmem:[#allocation7] sm:$0x3] %v222_v0 }
 0x185   :  { %v227_v2 = vld [vmem:[#allocation7] sm:$0x3] }
 0x186   :  { %v228_v4 = vmul.f32 0.00390625, %v227_v2 }
 0x188   :  { %v236_v5 = vadd.f32 %v255_v3, %v228_v4 }
 0x18a   :  { %237 = vst [vmem:[#allocation7] sm:$0x3] %v236_v5 }
 0x18b   :  { %332 = shalt.err (!%p329_p0)
}
 0x18c   :  { %247 = dma.vmem_to_hbm [thread:$0]  %s245_s27, 32, %s391_s3, [#allocation4]  }
 0x18d   :  { %345 = dma.done.wait [#allocation4], 32  }
 0x18e   :  { %346 = vsyncadd [#allocation4], 4294967264 }
 0x18f   :  { %251 = vsyncpa [#allocation3], 1 }
 0x190   :  { %252 = vsyncpa [#allocation6], 1 }
 0x191   :  { %253 = vsyncpa [#allocation4], 1 }

</bundles_post_ra>
